<compile_context>
chip_gen: v7x
topology: tpu7x:2x2x1
jax: 0.10.0
libtpu: 0.0.40
codegen_flags: <defaults>
</compile_context>

<pallas_src>
import functools

import jax
import jax.numpy as jnp
from jax.experimental import pallas as pl
from jax.experimental.pallas import tpu as pltpu


_TARGET_BLOCK_BYTES = 2 * 1024 * 1024      # ~2 MiB input-dtype data per block
_VMEM_PER_CORE_CAP = 64 * 1024 * 1024      # v7x per-TC VMEM; safe everywhere


def _round_up(n, m):
    return ((n + m - 1) // m) * m


def _sublane_multiple(dtype):
    # Rows per packed sublane group: 8 for 4-byte, 16 for 2-byte, 32 for 1-byte.
    return max(8, 32 // jnp.dtype(dtype).itemsize)


def _vmem_capacity_bytes():
    # Conservative per-TensorCore budget.  On v7x get_tpu_info() may report
    # per-chip capacity (2 TCs/chip); capping at 64 MiB keeps both the tile
    # budget and vmem_limit_bytes physical on every generation.
    try:
        cap = int(pltpu.get_tpu_info().vmem_capacity_bytes)
    except Exception:
        cap = _VMEM_PER_CORE_CAP
    return min(cap, _VMEM_PER_CORE_CAP)


def _num_tensorcores():
    # Best effort: 1 means "don't force extra grid splits" (right answer for
    # single-TC v5e/v6e); >1 enables megacore load-balance splitting (v7x).
    try:
        d = jax.devices()[0]
        n = getattr(d, "num_cores", None)
        if n is None:
            n = getattr(d, "core_count", 1)
        return max(1, int(n))
    except Exception:
        return 1


def _pick_tile(n, hidden, dtype, align, num_cores):
    """Pick a tile extent along the streamed (rows/cols) axis.

    Sized so that (a) ~2 MiB of input-dtype data is streamed per block and
    (b) the double-buffered in/out tiles plus ~3 fp32 working copies fit in a
    conservative slice of per-core VMEM.
    """
    itemsize = jnp.dtype(dtype).itemsize
    n_padded = _round_up(n, align)

    # Live VMEM per streamed unit: input + output double buffered (2x each) in
    # the input dtype, plus ~3 fp32 working copies (centered x, square, scaled).
    live_bytes = (4 * itemsize + 3 * 4) * hidden
    stream_bytes = itemsize * hidden

    vmem_budget = _vmem_capacity_bytes() // 3   # headroom for compiler scratch
    by_vmem = vmem_budget // max(live_bytes, 1)
    by_target = _TARGET_BLOCK_BYTES // max(stream_bytes, 1)

    tile = min(by_vmem, by_target)
    tile = max(align, (tile // align) * align)
    tile = min(tile, n_padded)

    # Megacore load balance: only split when >1 TensorCore exists, and then aim
    # for >= max(8, 2*cores) roughly equal blocks so neither core idles.
    if num_cores > 1 and n_padded > num_cores * align:
        min_steps = max(8, 2 * num_cores)
        balanced = max(align, _round_up(pl.cdiv(n_padded, min_steps), align))
        tile = min(tile, balanced)
    return int(tile)


def _vmem_limit_bytes(tile, hidden, dtype):
    itemsize = jnp.dtype(dtype).itemsize
    live = tile * hidden * (4 * itemsize + 3 * 4)   # buffers + fp32 temps
    need = live + (8 << 20)                         # Mosaic internal scratch
    return int(min(max(need, 16 << 20), (_vmem_capacity_bytes() * 3) // 4))


def _layernorm_rows_kernel(x_ref, w_ref, b_ref, o_ref, *, eps):
    # x_ref: (tile_rows, hidden); normalize over the last (lane) axis.
    # NOTE: rows of a masked partial last block hold uninitialized VMEM; their
    # results are discarded on store, so output is correct.
    x = x_ref[...]
    mean = jnp.mean(x, axis=-1, keepdims=True, dtype=jnp.float32)
    xc = x.astype(jnp.float32) - mean
    var = jnp.mean(xc * xc, axis=-1, keepdims=True)       # biased variance
    z = xc * jax.lax.rsqrt(var + eps)
    # w/b arrive pre-cast to fp32 from the wrapper: no per-step cast work.
    o_ref[...] = (z * w_ref[...] + b_ref[...]).astype(o_ref.dtype)


def _layernorm_cols_kernel(x_ref, w_ref, b_ref, o_ref, *, eps):
    # x_ref: (hidden, tile_cols) -- rows sit on the 128-wide lane axis, so
    # loads/stores are lane-dense even for hidden < 128; the reduction runs
    # over the sublane axis (axis 0).
    x = x_ref[...]
    mean = jnp.mean(x, axis=0, keepdims=True, dtype=jnp.float32)
    xc = x.astype(jnp.float32) - mean
    var = jnp.mean(xc * xc, axis=0, keepdims=True)
    z = xc * jax.lax.rsqrt(var + eps)
    o_ref[...] = (z * w_ref[...] + b_ref[...]).astype(o_ref.dtype)


def layer_norm_pallas(x, weight, bias, epsilon, *, cast_fp16=True, tile_rows=None):
    """Forward pass of the LayerNorm module (formula=0).  Returns (y,).

    cast_fp16 is accepted for API parity; the kernel always accumulates in
    fp32 and stores in the input dtype, which matches the PyTorch
    fp16 -> fp32 compute -> fp16 path exactly.
    """
    del cast_fp16  # fp32 accumulation is unconditional; result is identical.
    orig_shape = x.shape
    hidden = orig_shape[-1]
    rows = 1
    for d in orig_shape[:-1]:
        rows *= d

    eps = float(epsilon)
    num_cores = _num_tensorcores()
    out_dtype = x.dtype

    x2 = x.reshape(rows, hidden)
    w32 = weight.astype(jnp.float32)
    b32 = bias.astype(jnp.float32)

    # Narrow-hidden path: hidden < 128 would otherwise give masked, non
    # lane-dense stores (only hidden/128 useful lanes).  A wrapper transpose is
    # pure layout plumbing and lets rows occupy the lane axis instead.
    use_transposed = (tile_rows is None) and (hidden < 128)

    if use_transposed:
        x_t = x2.T                                    # (hidden, rows)
        w_col = w32.reshape(hidden, 1)
        b_col = b32.reshape(hidden, 1)
        if rows <= 128:
            tc = rows                                 # single full-extent block
        else:
            tc = _pick_tile(rows, hidden, x2.dtype, 128, num_cores)
        grid = (pl.cdiv(rows, tc),)
        vmem_limit = _vmem_limit_bytes(tc, hidden, x2.dtype)
        kernel = functools.partial(_layernorm_cols_kernel, eps=eps)

        y_t = pl.pallas_call(
            kernel,
            out_shape=jax.ShapeDtypeStruct((hidden, rows), out_dtype),
            grid_spec=pltpu.PrefetchScalarGridSpec(
                num_scalar_prefetch=0,
                grid=grid,
                in_specs=[
                    pl.BlockSpec((hidden, tc), lambda i: (0, i)),
                    pl.BlockSpec((hidden, 1), lambda i: (0, 0)),
                    pl.BlockSpec((hidden, 1), lambda i: (0, 0)),
                ],
                out_specs=pl.BlockSpec((hidden, tc), lambda i: (0, i)),
            ),
            compiler_params=pltpu.CompilerParams(
                dimension_semantics=("parallel",),
                vmem_limit_bytes=vmem_limit,
            ),
        )(x_t, w_col, b_col)
        return (y_t.T.reshape(orig_shape),)

    # Regular row-major path (lane-dense whenever hidden is a multiple of 128).
    sub = _sublane_multiple(x2.dtype)
    if tile_rows is not None:
        tr = min(max(sub, _round_up(int(tile_rows), sub)), _round_up(rows, sub))
    else:
        tr = _pick_tile(rows, hidden, x2.dtype, sub, num_cores)
    grid = (pl.cdiv(rows, tr),)
    vmem_limit = _vmem_limit_bytes(tr, hidden, x2.dtype)
    kernel = functools.partial(_layernorm_rows_kernel, eps=eps)

    w_row = w32.reshape(1, hidden)
    b_row = b32.reshape(1, hidden)

    y2 = pl.pallas_call(
        kernel,
        out_shape=jax.ShapeDtypeStruct((rows, hidden), out_dtype),
        grid_spec=pltpu.PrefetchScalarGridSpec(
            num_scalar_prefetch=0,
            grid=grid,
            in_specs=[
                pl.BlockSpec((tr, hidden), lambda i: (i, 0)),
                pl.BlockSpec((1, hidden), lambda i: (0, 0)),
                pl.BlockSpec((1, hidden), lambda i: (0, 0)),
            ],
            out_specs=pl.BlockSpec((tr, hidden), lambda i: (i, 0)),
        ),
        compiler_params=pltpu.CompilerParams(
            dimension_semantics=("parallel",),
            vmem_limit_bytes=vmem_limit,
        ),
    )(x2, w_row, b_row)

    return (y2.reshape(orig_shape),)


if __name__ == "__main__":
    # Module config (synthetic, deterministic init — no checkpoint load).
    batch, seq, hidden = 2, 8, 32
    epsilon = 1e-5

    key = jax.random.PRNGKey(0)
    kx, kw, kb, kx2, kw2, kb2, kx3 = jax.random.split(key, 7)

    # __init__: weight ~ N(0, 0.5), bias ~ N(0, 0.1)
    weight = 0.5 * jax.random.normal(kw, (hidden,), dtype=jnp.float32)
    bias = 0.1 * jax.random.normal(kb, (hidden,), dtype=jnp.float32)
    x = jax.random.normal(kx, (batch, seq, hidden), dtype=jnp.float32)

    def ref_ln(xv, w, b, eps):
        xf = xv.astype(jnp.float32)
        mu = jnp.mean(xf, axis=-1, keepdims=True)
        var = jnp.mean((xf - mu) ** 2, axis=-1, keepdims=True)
        return (((xf - mu) * jax.lax.rsqrt(var + eps)) * w + b).astype(xv.dtype)

    # 1) Narrow hidden (32) -> transposed, lane-dense path.
    (y,) = layer_norm_pallas(x, weight, bias, epsilon, cast_fp16=True)
    jax.block_until_ready(y)
    assert jnp.allclose(y, ref_ln(x, weight, bias, epsilon), atol=1e-5, rtol=1e-5)

    # 2) Non-divisible row count (rows=15) on the narrow path.
    x_odd = jax.random.normal(kx2, (3, 5, hidden), dtype=jnp.float32)
    (y_odd,) = layer_norm_pallas(x_odd, weight, bias, epsilon)
    jax.block_until_ready(y_odd)
    assert jnp.allclose(y_odd, ref_ln(x_odd, weight, bias, epsilon),
                        atol=1e-5, rtol=1e-5)

    # 3) hidden=128 -> regular row-major (lane-dense) path.
    hidden_w = 128
    weight_w = 0.5 * jax.random.normal(kw2, (hidden_w,), dtype=jnp.float32)
    bias_w = 0.1 * jax.random.normal(kb2, (hidden_w,), dtype=jnp.float32)
    x_wide = jax.random.normal(kx3, (batch, seq, hidden_w), dtype=jnp.float32)
    (y_wide,) = layer_norm_pallas(x_wide, weight_w, bias_w, epsilon)
    jax.block_until_ready(y_wide)
    assert jnp.allclose(y_wide, ref_ln(x_wide, weight_w, bias_w, epsilon),
                        atol=1e-5, rtol=1e-5)

    # 4) Reduced-precision input (bf16): fp32 accumulate, bf16 store — the
    #    analogue of the module's cast_fp16 path.
    x_bf = x_wide.astype(jnp.bfloat16)
    (y_bf,) = layer_norm_pallas(x_bf, weight_w, bias_w, epsilon, cast_fp16=True)
    jax.block_until_ready(y_bf)
    assert jnp.allclose(y_bf.astype(jnp.float32),
                        ref_ln(x_bf, weight_w, bias_w, epsilon).astype(jnp.float32),
                        atol=5e-2, rtol=5e-2)

    print("KERNEL_OK")
</pallas_src>

<mosaic_0001>
module attributes {stable_mosaic.version = 11 : i64} {
  func.func @_layernorm_cols_kernel(%arg0: i32, %arg1: memref<32x16xf32, #tpu.memory_space<vmem>>, %arg2: memref<32x1xf32, #tpu.memory_space<vmem>>, %arg3: memref<32x1xf32, #tpu.memory_space<vmem>>, %arg4: memref<32x16xf32, #tpu.memory_space<vmem>>) attributes {dimension_semantics = [#tpu.dimension_semantics<parallel>], iteration_bounds = array<i64: 1>, scalar_prefetch = 0 : i64, scratch_operands = 0 : i64, tpu.core_type = #tpu.core_type<tc>, window_params = [{transform_indices = @transform_0, window_bounds = array<i64: 32, 16>}, {pipeline_mode = #tpu.pipeline_mode<synchronous>, transform_indices = @transform_1, window_bounds = array<i64: 32, 1>}, {pipeline_mode = #tpu.pipeline_mode<synchronous>, transform_indices = @transform_2, window_bounds = array<i64: 32, 1>}, {transform_indices = @transform_3, window_bounds = array<i64: 32, 16>}]} {
    %c0 = arith.constant 0 : index
    %c0_0 = arith.constant 0 : index
    %0 = vector.load %arg1[%c0, %c0_0] : memref<32x16xf32, #tpu.memory_space<vmem>>, vector<32x16xf32>
    %cst = arith.constant dense<0.000000e+00> : vector<16xf32>
    %1 = vector.multi_reduction <add>, %0, %cst [0] : vector<32x16xf32> to vector<16xf32>
    %2 = vector.shape_cast %1 : vector<16xf32> to vector<1x16xf32>
    %cst_1 = arith.constant 3.200000e+01 : f32
    %3 = vector.broadcast %cst_1 : f32 to vector<1x16xf32>
    %4 = arith.divf %2, %3 : vector<1x16xf32>
    %5 = vector.broadcast %4 : vector<1x16xf32> to vector<32x16xf32>
    %6 = arith.subf %0, %5 : vector<32x16xf32>
    %7 = arith.mulf %6, %6 : vector<32x16xf32>
    %cst_2 = arith.constant dense<0.000000e+00> : vector<16xf32>
    %8 = vector.multi_reduction <add>, %7, %cst_2 [0] : vector<32x16xf32> to vector<16xf32>
    %9 = vector.shape_cast %8 : vector<16xf32> to vector<1x16xf32>
    %cst_3 = arith.constant 3.200000e+01 : f32
    %10 = vector.broadcast %cst_3 : f32 to vector<1x16xf32>
    %11 = arith.divf %9, %10 : vector<1x16xf32>
    %cst_4 = arith.constant 9.99999974E-6 : f32
    %12 = vector.broadcast %cst_4 : f32 to vector<1x16xf32>
    %13 = arith.addf %11, %12 : vector<1x16xf32>
    %14 = math.rsqrt %13 : vector<1x16xf32>
    %15 = vector.broadcast %14 : vector<1x16xf32> to vector<32x16xf32>
    %16 = arith.mulf %6, %15 : vector<32x16xf32>
    %c0_5 = arith.constant 0 : index
    %c0_6 = arith.constant 0 : index
    %17 = vector.load %arg2[%c0_5, %c0_6] : memref<32x1xf32, #tpu.memory_space<vmem>>, vector<32x1xf32>
    %18 = vector.broadcast %17 : vector<32x1xf32> to vector<32x16xf32>
    %19 = arith.mulf %16, %18 : vector<32x16xf32>
    %c0_7 = arith.constant 0 : index
    %c0_8 = arith.constant 0 : index
    %20 = vector.load %arg3[%c0_7, %c0_8] : memref<32x1xf32, #tpu.memory_space<vmem>>, vector<32x1xf32>
    %21 = vector.broadcast %20 : vector<32x1xf32> to vector<32x16xf32>
    %22 = arith.addf %19, %21 : vector<32x16xf32>
    %c0_9 = arith.constant 0 : index
    %c0_10 = arith.constant 0 : index
    %23 = vector.load %arg4[%c0_9, %c0_10] : memref<32x16xf32, #tpu.memory_space<vmem>>, vector<32x16xf32>
    tpu.vector_store %arg4[%c0_9, %c0_10], %22 {strides = array<i32>} : memref<32x16xf32, #tpu.memory_space<vmem>>, vector<32x16xf32>,
    return
  }
  func.func @transform_0(%arg0: i32) -> (i32, i32) {
    %c0_i32 = arith.constant 0 : i32
    %c0_i32_0 = arith.constant 0 : i32
    return %c0_i32, %arg0 : i32, i32
  }
  func.func @transform_1(%arg0: i32) -> (i32, i32) {
    %c0_i32 = arith.constant 0 : i32
    %c0_i32_0 = arith.constant 0 : i32
    %c0_i32_1 = arith.constant 0 : i32
    return %c0_i32, %c0_i32_0 : i32, i32
  }
  func.func @transform_2(%arg0: i32) -> (i32, i32) {
    %c0_i32 = arith.constant 0 : i32
    %c0_i32_0 = arith.constant 0 : i32
    %c0_i32_1 = arith.constant 0 : i32
    return %c0_i32, %c0_i32_0 : i32, i32
  }
  func.func @transform_3(%arg0: i32) -> (i32, i32) {
    %c0_i32 = arith.constant 0 : i32
    %c0_i32_0 = arith.constant 0 : i32
    return %c0_i32, %arg0 : i32, i32
  }
}

</mosaic_0001>

<bundles_post_ra>
// kernel: tpu_custom_call.1
= control target key start
LH: loop header
LB: loop body
LE: loop exit
PB: predicated region body
PF: predicated region fallthrough
CT: control target
= control target key end

     0   :  { %v131_v0 = vmov 0   ;;  %vm18_vm0 = vcmask 130048   ;;  %s212_s1 = inlined_call_operand.vmem [shape: f32[32,1], index: 1, kind: input, shape index: {}]   ;;  %s213_s2 = inlined_call_operand.vmem [shape: f32[32,1], index: 2, kind: input, shape index: {}]   ;;  %s214_s0 = inlined_call_operand.vmem [shape: f32[32,16], index: 0, kind: input, shape index: {}]   ;;  %s215_s3 = inlined_call_operand.vmem [shape: f32[32,16], index: 3, kind: output, shape index: {}]  }
   0x1   :  { %128 = vset.pattern.permute.xlu1 %v131_v0  ;;  %127 = vset.pattern.permute.xlu0 %v131_v0  ;;  %v64_v1 = vld [vmem:[%s212_s1 + $0x10] sm:$0xff]  ;;  %v62_v2 = vld [vmem:[%s212_s1] sm:$0xff]  ;;  %v65_v3 = vld [vmem:[%s212_s1 + $0x18] sm:$0xff] }
   0x2   :  { %78 = vperm.xlu1 %128, %v64_v1   ;;  %68 = vperm.xlu0 %127, %v62_v2   ;;  %v63_v4 = vld [vmem:[%s212_s1 + $0x8] sm:$0xff]  ;;  %v90_v6 = vld [vmem:[%s213_s2] sm:$0xff]  ;;  %v93_v7 = vld [vmem:[%s213_s2 + $0x18] sm:$0xff] }
   0x3   :  { %v91_v5 = vld [vmem:[%s213_s2 + $0x8] sm:$0xff]  ;;  %v92_v8 = vld [vmem:[%s213_s2 + $0x10] sm:$0xff]  ;;  %v14_v9 = vld [vmem:[%s214_s0] sm:$0xff] }
   0x4   :  { %v15_v10 = vld [vmem:[%s214_s0 + $0x8] sm:$0xff]  ;;  %v19_v11 = vsel %vm18_vm0, %v14_v9, 0.0  ;;  %v16_v13 = vld [vmem:[%s214_s0 + $0x10] sm:$0xff]  ;;  %v17_v16 = vld [vmem:[%s214_s0 + $0x18] sm:$0xff] }
   0x5   :  { %v20_v12 = vsel %vm18_vm0, %v15_v10, 0.0  ;;  %v22_v15 = vsel %vm18_vm0, %v16_v13, 0.0  ;;  %v24_v18 = vsel %vm18_vm0, %v17_v16, 0.0 }
   0x6   :  { %83 = vperm.xlu1 %128, %v65_v3   ;;  %73 = vperm.xlu0 %127, %v63_v4   ;;  %v21_v14 = vadd.f32 %v20_v12, %v19_v11 }
   0x8   :  { %v23_v17 = vadd.f32 %v22_v15, %v21_v14 }
   0xa   :  { %101 = vperm.xlu1 %128, %v91_v5   ;;  %96 = vperm.xlu0 %127, %v90_v6   ;;  %v25_v19 = vadd.f32 %v24_v18, %v23_v17 }
   0xc   :  { %v26_v20 = vrot.slane %v25_v19, 4 }
   0xe   :  { %111 = vperm.xlu1 %128, %v93_v7   ;;  %106 = vperm.xlu0 %127, %v92_v8   ;;  %v27_v21 = vadd.f32 %v26_v20, %v25_v19 }
  0x10   :  { %v28_v22 = vrot.slane %v27_v21, 2 }
  0x12   :  { %v29_v23 = vadd.f32 %v28_v22, %v27_v21 }
  0x14   :  { %v30_v24 = vrot.slane %v29_v23, 1 }
  0x16   :  { %v31_v25 = vadd.f32 %v30_v24, %v29_v23 }
  0x18   :  { %v33_v26 = vmul.f32 0.03125, %v31_v25 }
  0x1a   :  { %v34_v27 = vsub.f32 %v14_v9, %v33_v26  ;;  %v35_v28 = vsub.f32 %v15_v10, %v33_v26  ;;  %v36_v29 = vsub.f32 %v16_v13, %v33_v26  ;;  %v37_v32 = vsub.f32 %v17_v16, %v33_v26 }
  0x1c   :  { %v38_v30 = vmul.f32 %v34_v27, %v34_v27  ;;  %v39_v31 = vmul.f32 %v35_v28, %v35_v28  ;;  %v40_v33 = vmul.f32 %v36_v29, %v36_v29  ;;  %v41_v37 = vmul.f32 %v37_v32, %v37_v32 }
  0x1e   :  { %v42_v34 = vsel %vm18_vm0, %v38_v30, 0.0  ;;  %v43_v35 = vsel %vm18_vm0, %v39_v31, 0.0  ;;  %v45_v38 = vsel %vm18_vm0, %v40_v33, 0.0  ;;  %v47_v40 = vsel %vm18_vm0, %v41_v37, 0.0 }
  0x1f   :  { %v44_v36 = vadd.f32 %v43_v35, %v42_v34 }
  0x21   :  { %v46_v39 = vadd.f32 %v45_v38, %v44_v36 }
  0x23   :  { %v48_v41 = vadd.f32 %v47_v40, %v46_v39 }
  0x25   :  { %v49_v42 = vrot.slane %v48_v41, 4 }
  0x27   :  { %v50_v43 = vadd.f32 %v49_v42, %v48_v41 }
  0x29   :  { %v51_v44 = vrot.slane %v50_v43, 2 }
  0x2b   :  { %v52_v45 = vadd.f32 %v51_v44, %v50_v43 }
  0x2d   :  { %v53_v46 = vrot.slane %v52_v45, 1 }
  0x2f   :  { %v54_v47 = vadd.f32 %v53_v46, %v52_v45 }
  0x31   :  { %v55_v48 = vmul.f32 0.03125, %v54_v47 }
  0x33   :  { %v56_v49 = vadd.f32 1e-05, %v55_v48 }
  0x35   :  { %129 = vrsqrt.f32 %v56_v49 }
  0x3f   :  { %v130_v50 = vpop.eup %129 }
  0x40   :  { %v58_v53 = vmul.f32 %v130_v50, %v34_v27  ;;  %v59_v54 = vmul.f32 %v130_v50, %v35_v28  ;;  %v60_v57 = vmul.f32 %v130_v50, %v36_v29  ;;  %v61_v59 = vmul.f32 %v130_v50, %v37_v32 }
  0x81   :  { %v79_v51 = vpop.permute.xlu1 %78  ;;  %v69_v52 = vpop.permute.xlu0 %68 }
  0x82   :  { %v86_v58 = vmul.f32 %v69_v52, %v58_v53  ;;  %v88_v1 = vmul.f32 %v79_v51, %v60_v57 }
  0x85   :  { %v84_v55 = vpop.permute.xlu1 %83  ;;  %v74_v56 = vpop.permute.xlu0 %73 }
  0x86   :  { %v87_v60 = vmul.f32 %v74_v56, %v59_v54  ;;  %v89_v2 = vmul.f32 %v84_v55, %v61_v59 }
  0x89   :  { %v102_v61 = vpop.permute.xlu1 %101  ;;  %v97_v62 = vpop.permute.xlu0 %96 }
  0x8a   :  { %v115_v63 = vadd.f32 %v102_v61, %v87_v60  ;;  %v114_v0 = vadd.f32 %v97_v62, %v86_v58 }
  0x8c   :  { %119 = vst.msk [vmem:[%s215_s3 + $0x8] sm:$0xff] %vm18_vm0, %v115_v63  ;;  %118 = vst.msk [vmem:[%s215_s3] sm:$0xff] %vm18_vm0, %v114_v0 }
  0x8d   :  { %v112_v3 = vpop.permute.xlu1 %111  ;;  %v107_v4 = vpop.permute.xlu0 %106 }
  0x8e   :  { %v117_v5 = vadd.f32 %v112_v3, %v89_v2  ;;  %v116_v6 = vadd.f32 %v107_v4, %v88_v1 }
  0x90   :  { %121 = vst.msk [vmem:[%s215_s3 + $0x18] sm:$0xff] %vm18_vm0, %v117_v5  ;;  %120 = vst.msk [vmem:[%s215_s3 + $0x10] sm:$0xff] %vm18_vm0, %v116_v6 }

</bundles_post_ra>
